<compile_context>
chip_gen: v6e
topology: v6e:2x2x1
jax: 0.10.0
libtpu: 0.0.40
codegen_flags: <defaults>
</compile_context>

<pallas_src>
import functools
import math

import jax
import jax.numpy as jnp
from jax.experimental import pallas as pl
from jax.experimental.pallas import tpu as pltpu

# cfg.MODEL.HEADS.* constants (synthetic, deterministic)
SCALE = 64.0
MARGIN = 0.50
COS_M = math.cos(MARGIN)
SIN_M = math.sin(MARGIN)
THRESHOLD = math.cos(math.pi - MARGIN)
MM = math.sin(math.pi - MARGIN) * MARGIN
EPS = 1e-12  # F.normalize default eps


# --------------------------------------------------------------------------
# Kernel 1: per-batch prologue (O(B*D)), run once.
# --------------------------------------------------------------------------
def _prologue_kernel(feat_ref, w_tgt_ref, t_ref,
                     feat_n_ref, ctm_ref, ftl_ref, t_out_ref):
    feat = feat_ref[...].astype(jnp.float32)        # (B, D)
    w_tgt = w_tgt_ref[...].astype(jnp.float32)      # (B, D) = weight[targets]
    b = feat.shape[0]

    # F.normalize: x / max(||x||, eps)  ==  x * rsqrt(max(||x||^2, eps^2))
    inv_f = jax.lax.rsqrt(
        jnp.maximum(jnp.sum(feat * feat, axis=-1, keepdims=True), EPS * EPS))
    feat_n = feat * inv_f
    inv_w = jax.lax.rsqrt(
        jnp.maximum(jnp.sum(w_tgt * w_tgt, axis=-1, keepdims=True), EPS * EPS))
    w_tgt_n = w_tgt * inv_w

    # target_logit[i] = cos_theta[i, targets[i]]  (f32, independent of C).
    # Clip before the sqrt so 1 - tl^2 >= 0 (matches the reference clamp).
    target_logit = jnp.clip(
        jnp.sum(feat_n * w_tgt_n, axis=-1, keepdims=True), -1.0, 1.0)  # (B, 1)

    sin_theta = jnp.sqrt(jnp.maximum(1.0 - target_logit * target_logit, 0.0))
    cos_theta_m = target_logit * COS_M - sin_theta * SIN_M
    final_tl = jnp.where(target_logit > THRESHOLD,
                         cos_theta_m, target_logit - MM)

    # buffer update (done BEFORE the hard-example rescale, as in the module):
    #   t = 0.01 * mean(target_logit) + 0.99 * t
    t_old = t_ref[0, 0]
    t_new = 0.01 * (jnp.sum(target_logit) / jnp.float32(b)) + 0.99 * t_old
    t_out_ref[0, 0] = t_new

    feat_n_ref[...] = feat_n.astype(feat_n_ref.dtype)   # bf16 for the MXU
    ctm_ref[...] = cos_theta_m
    ftl_ref[...] = final_tl


# --------------------------------------------------------------------------
# Kernel 2: class/batch-tiled logits (grid over (class tiles, batch tiles)).
# --------------------------------------------------------------------------
def _logits_kernel(tgt_ref, ctm_ref, ftl_ref, t_ref, feat_n_ref, w_ref,
                   out_ref, *, num_classes):
    j = pl.program_id(0)                   # class-tile index (outer axis)
    tile_c = out_ref.shape[1]

    # Per-class inverse L2 norm, lane-dense (1, Tc): ones(1,D) @ (w*w)^T.
    # (Tiny MXU matvec; avoids a (Tc,1)->(1,Tc) relayout.)
    w = w_ref[...].astype(jnp.float32)                                  # (Tc, D)
    ones_row = jnp.ones((1, w.shape[1]), dtype=jnp.float32)
    ssq = jax.lax.dot_general(ones_row, w * w, (((1,), (1,)), ((), ())),
                              preferred_element_type=jnp.float32)       # (1, Tc)
    inv_w = jax.lax.rsqrt(jnp.maximum(ssq, EPS * EPS))                  # (1, Tc)

    # cos_theta tile: bf16 MXU on the RAW weight tile (f32 accumulate), then
    # column-scale by inv_w post-accumulate (normalization is scale-invariant,
    # so this is numerically equivalent and skips an O(Tc*D) f32 rescale).
    cos_theta = jax.lax.dot_general(
        feat_n_ref[...], w_ref[...].astype(jnp.bfloat16),
        (((1,), (1,)), ((), ())),
        preferred_element_type=jnp.float32) * inv_w                     # (Tb, Tc)
    cos_theta = jnp.clip(cos_theta, -1.0, 1.0)

    # One-hot of the target column restricted to this tile's class range.
    cls = jax.lax.broadcasted_iota(jnp.int32, cos_theta.shape, 1) + j * tile_c
    onehot = cls == tgt_ref[...]                                        # (Tb, Tc)

    t = t_ref[0, 0]          # updated EMA t (scalar, SMEM)
    ctm = ctm_ref[...]       # (Tb, 1) cos_theta_m
    ftl = ftl_ref[...]       # (Tb, 1) final_target_logit

    # Fused epilogue: hard-example rescale, target-column scatter, scale.
    hard = cos_theta * (t + cos_theta)
    logits = jnp.where(
        onehot, ftl, jnp.where(cos_theta > ctm, hard, cos_theta)) * SCALE

    if num_classes % tile_c != 0:
        # Ragged last class tile: padded columns carry undefined weight data.
        # The partial output block is masked on write anyway; this select just
        # keeps the in-kernel values defined.  Free elsewhere (static branch).
        logits = jnp.where(cls < num_classes, logits, 0.0)

    out_ref[...] = logits


# --------------------------------------------------------------------------
# Wrapper
# --------------------------------------------------------------------------
def _choose_tile_c(c, d, tile_b, w_itemsize):
    # ~4 MiB raw weight tile (HBM-bound stream; roofline saturates by 1-4 MiB)
    by_weight = (4 * 1024 * 1024) // (w_itemsize * d)
    # ~4 MiB f32 output tile (also bounds the (Tb, Tc) epilogue temporaries)
    by_output = (4 * 1024 * 1024) // (4 * tile_b)
    tile = max(128, min(by_weight, by_output) // 128 * 128)
    tile = min(tile, pl.cdiv(c, 128) * 128)          # don't exceed (128-padded) C
    return int(tile)


def _vmem_limit_bytes():
    try:
        cap = pltpu.get_tpu_info().vmem_capacity_bytes
    except Exception:
        cap = 64 * 1024 * 1024
    # 3/4 of per-core VMEM: 48 MiB on v7x (64 MiB), 96 MiB on v5e/v6e (128 MiB)
    return int(min(96 * 1024 * 1024, max(32 * 1024 * 1024, (cap * 3) // 4)))


def arc_softmax(features, weight, targets, t, *, tile_c=None, tile_b=None):
    """features: (B, D) f32, weight: (C, D) f32/bf16, targets: (B,) int, t: (1,) f32."""
    B, D = features.shape
    C = weight.shape[0]
    features = features.astype(jnp.float32)
    targets_i32 = targets.astype(jnp.int32)
    targets2d = targets_i32.reshape(B, 1)
    t2d = t.reshape(1, 1).astype(jnp.float32)

    # O(B*D) gather of the target-class weight rows; feeds the target-logit
    # dot so the margin math never touches the full (B, C) matrix.
    # (Fusing this gather into the kernel via per-row DMA is possible but the
    # saving is negligible vs. the (C, D) weight stream, so it stays in XLA.)
    w_tgt = jnp.take(weight, targets_i32, axis=0)                     # (B, D)

    feat_n, ctm, ftl, t_new = pl.pallas_call(
        _prologue_kernel,
        out_shape=(jax.ShapeDtypeStruct((B, D), jnp.bfloat16),
                   jax.ShapeDtypeStruct((B, 1), jnp.float32),
                   jax.ShapeDtypeStruct((B, 1), jnp.float32),
                   jax.ShapeDtypeStruct((1, 1), jnp.float32)),
        in_specs=[
            pl.BlockSpec(memory_space=pltpu.MemorySpace.VMEM),   # features
            pl.BlockSpec(memory_space=pltpu.MemorySpace.VMEM),   # weight[targets]
            pl.BlockSpec(memory_space=pltpu.MemorySpace.SMEM),   # t (scalar)
        ],
        out_specs=(
            pl.BlockSpec(memory_space=pltpu.MemorySpace.VMEM),   # feat_n (bf16)
            pl.BlockSpec(memory_space=pltpu.MemorySpace.VMEM),   # cos_theta_m
            pl.BlockSpec(memory_space=pltpu.MemorySpace.VMEM),   # final_target_logit
            pl.BlockSpec(memory_space=pltpu.MemorySpace.SMEM),   # new t (scalar)
        ),
    )(features, w_tgt, t2d)

    # ----- class/batch-tiled main kernel (no hot-path padding of the weight) --
    if tile_b is None:
        tile_b = B if B <= 256 else 256
    if tile_c is None:
        tile_c = _choose_tile_c(C, D, tile_b, jnp.dtype(weight.dtype).itemsize)
    n_c = pl.cdiv(C, tile_c)
    n_b = pl.cdiv(B, tile_b)

    cost = pl.CostEstimate(
        flops=2 * B * C * D,
        transcendentals=0,
        bytes_accessed=C * D * weight.dtype.itemsize + B * D * 2 + B * C * 4)

    kernel = functools.partial(_logits_kernel, num_classes=C)

    logits = pl.pallas_call(
        kernel,
        out_shape=jax.ShapeDtypeStruct((B, C), jnp.float32),
        # class tiles outer so each weight tile is DMA'd exactly once;
        # batch tiles inner (feat/targets re-fetches are tiny).
        grid=(n_c, n_b),
        in_specs=[
            pl.BlockSpec((tile_b, 1), lambda j, i: (i, 0)),          # targets
            pl.BlockSpec((tile_b, 1), lambda j, i: (i, 0)),          # cos_theta_m
            pl.BlockSpec((tile_b, 1), lambda j, i: (i, 0)),          # final_target_logit
            pl.BlockSpec(memory_space=pltpu.MemorySpace.SMEM),       # t (scalar)
            pl.BlockSpec((tile_b, D), lambda j, i: (i, 0)),          # feat_n (bf16)
            pl.BlockSpec((tile_c, D), lambda j, i: (j, 0)),          # weight tile
        ],
        out_specs=pl.BlockSpec((tile_b, tile_c), lambda j, i: (i, j)),  # lane-dense
        compiler_params=pltpu.CompilerParams(
            dimension_semantics=("parallel", "parallel"),
            vmem_limit_bytes=_vmem_limit_bytes()),
        cost_estimate=cost,
    )(targets2d, ctm, ftl, t_new, feat_n, weight)

    return logits, t_new.reshape(1)


if __name__ == "__main__":
    B, D, C = 8, 32, 128  # batch, in_feat, num_classes (small demo shapes)

    key = jax.random.PRNGKey(0)
    k_feat, k_w, k_tgt = jax.random.split(key, 3)

    features = jax.random.normal(k_feat, (B, D), dtype=jnp.float32)

    # nn.init.xavier_uniform_ on weight of shape (num_classes, in_feat)
    bound = math.sqrt(6.0 / (C + D))
    weight = jax.random.uniform(k_w, (C, D), dtype=jnp.float32,
                                minval=-bound, maxval=bound)

    targets = jax.random.randint(k_tgt, (B,), 0, C, dtype=jnp.int32)
    t_buf = jnp.zeros((1,), dtype=jnp.float32)  # register_buffer('t', zeros(1))

    logits, t_new = arc_softmax(features, weight, targets, t_buf)
    jax.block_until_ready((logits, t_new))

    assert logits.shape == (B, C) and logits.dtype == jnp.float32
    assert t_new.shape == (1,)
    assert bool(jnp.all(jnp.isfinite(logits)))
    print("KERNEL_OK")
</pallas_src>

<mosaic_0001>
module attributes {stable_mosaic.version = 11 : i64} {
  func.func @_prologue_kernel(%arg0: memref<8x32xf32, #tpu.memory_space<vmem>>, %arg1: memref<8x32xf32, #tpu.memory_space<vmem>>, %arg2: memref<1x1xf32, #tpu.memory_space<smem>>, %arg3: memref<8x32xbf16, #tpu.memory_space<vmem>>, %arg4: memref<8x1xf32, #tpu.memory_space<vmem>>, %arg5: memref<8x1xf32, #tpu.memory_space<vmem>>, %arg6: memref<1x1xf32, #tpu.memory_space<smem>>) attributes {dimension_semantics = [], scalar_prefetch = 0 : i64, scratch_operands = 0 : i64, tpu.core_type = #tpu.core_type<tc>} {
    %c0 = arith.constant 0 : index
    %c0_0 = arith.constant 0 : index
    %0 = vector.load %arg0[%c0, %c0_0] : memref<8x32xf32, #tpu.memory_space<vmem>>, vector<8x32xf32>
    %c0_1 = arith.constant 0 : index
    %c0_2 = arith.constant 0 : index
    %1 = vector.load %arg1[%c0_1, %c0_2] : memref<8x32xf32, #tpu.memory_space<vmem>>, vector<8x32xf32>
    %2 = arith.mulf %0, %0 : vector<8x32xf32>
    %cst = arith.constant dense<0.000000e+00> : vector<8xf32>
    %3 = vector.multi_reduction <add>, %2, %cst [1] : vector<8x32xf32> to vector<8xf32>
    %4 = vector.shape_cast %3 : vector<8xf32> to vector<8x1xf32>
    %cst_3 = arith.constant 1.000000e-24 : f32
    %5 = vector.broadcast %cst_3 : f32 to vector<8x1xf32>
    %6 = arith.maximumf %4, %5 : vector<8x1xf32>
    %7 = math.rsqrt %6 : vector<8x1xf32>
    %8 = vector.broadcast %7 : vector<8x1xf32> to vector<8x32xf32>
    %9 = arith.mulf %0, %8 : vector<8x32xf32>
    %10 = arith.mulf %1, %1 : vector<8x32xf32>
    %cst_4 = arith.constant dense<0.000000e+00> : vector<8xf32>
    %11 = vector.multi_reduction <add>, %10, %cst_4 [1] : vector<8x32xf32> to vector<8xf32>
    %12 = vector.shape_cast %11 : vector<8xf32> to vector<8x1xf32>
    %cst_5 = arith.constant 1.000000e-24 : f32
    %13 = vector.broadcast %cst_5 : f32 to vector<8x1xf32>
    %14 = arith.maximumf %12, %13 : vector<8x1xf32>
    %15 = math.rsqrt %14 : vector<8x1xf32>
    %16 = vector.broadcast %15 : vector<8x1xf32> to vector<8x32xf32>
    %17 = arith.mulf %1, %16 : vector<8x32xf32>
    %18 = arith.mulf %9, %17 : vector<8x32xf32>
    %cst_6 = arith.constant dense<0.000000e+00> : vector<8xf32>
    %19 = vector.multi_reduction <add>, %18, %cst_6 [1] : vector<8x32xf32> to vector<8xf32>
    %20 = vector.shape_cast %19 : vector<8xf32> to vector<8x1xf32>
    %cst_7 = arith.constant -1.000000e+00 : f32
    %cst_8 = arith.constant 1.000000e+00 : f32
    %21 = vector.broadcast %cst_7 : f32 to vector<8x1xf32>
    %22 = arith.maximumf %21, %20 : vector<8x1xf32>
    %23 = vector.broadcast %cst_8 : f32 to vector<8x1xf32>
    %24 = arith.minimumf %23, %22 : vector<8x1xf32>
    %25 = arith.mulf %24, %24 : vector<8x1xf32>
    %cst_9 = arith.constant 1.000000e+00 : f32
    %26 = vector.broadcast %cst_9 : f32 to vector<8x1xf32>
    %27 = arith.subf %26, %25 : vector<8x1xf32>
    %cst_10 = arith.constant 0.000000e+00 : f32
    %28 = vector.broadcast %cst_10 : f32 to vector<8x1xf32>
    %29 = arith.maximumf %27, %28 : vector<8x1xf32>
    %30 = math.sqrt %29 : vector<8x1xf32>
    %cst_11 = arith.constant 0.87758255 : f32
    %31 = vector.broadcast %cst_11 : f32 to vector<8x1xf32>
    %32 = arith.mulf %24, %31 : vector<8x1xf32>
    %cst_12 = arith.constant 0.47942555 : f32
    %33 = vector.broadcast %cst_12 : f32 to vector<8x1xf32>
    %34 = arith.mulf %30, %33 : vector<8x1xf32>
    %35 = arith.subf %32, %34 : vector<8x1xf32>
    %cst_13 = arith.constant -0.87758255 : f32
    %36 = vector.broadcast %cst_13 : f32 to vector<8x1xf32>
    %37 = arith.cmpf ogt, %24, %36 : vector<8x1xf32>
    %cst_14 = arith.constant 0.239712775 : f32
    %38 = vector.broadcast %cst_14 : f32 to vector<8x1xf32>
    %39 = arith.subf %24, %38 : vector<8x1xf32>
    %40 = arith.select %37, %35, %39 : vector<8x1xi1>, vector<8x1xf32>
    %c0_15 = arith.constant 0 : index
    %c0_16 = arith.constant 0 : index
    %41 = memref.load %arg2[%c0_15, %c0_16] : memref<1x1xf32, #tpu.memory_space<smem>>
    %42 = vector.shape_cast %24 : vector<8x1xf32> to vector<1x8x1xf32>
    %cst_17 = arith.constant dense<0.000000e+00> : vector<1xf32>
    %43 = vector.multi_reduction <add>, %42, %cst_17 [1, 2] : vector<1x8x1xf32> to vector<1xf32>
    %44 = vector.shape_cast %43 : vector<1xf32> to vector<1x1x1xf32>
    %45 = vector.extract %44[0, 0, 0] : f32 from vector<1x1x1xf32>
    %cst_18 = arith.constant 8.000000e+00 : f32
    %46 = arith.divf %45, %cst_18 : f32
    %cst_19 = arith.constant 0.00999999977 : f32
    %47 = arith.mulf %cst_19, %46 : f32
    %cst_20 = arith.constant 9.900000e-01 : f32
    %48 = arith.mulf %cst_20, %41 : f32
    %49 = arith.addf %47, %48 : f32
    %c0_21 = arith.constant 0 : index
    %c0_22 = arith.constant 0 : index
    %50 = memref.load %arg6[%c0_21, %c0_22] : memref<1x1xf32, #tpu.memory_space<smem>>
    memref.store %49, %arg6[%c0_21, %c0_22] : memref<1x1xf32, #tpu.memory_space<smem>>
    %51 = arith.truncf %9 : vector<8x32xf32> to vector<8x32xbf16>
    %c0_23 = arith.constant 0 : index
    %c0_24 = arith.constant 0 : index
    %52 = vector.load %arg3[%c0_23, %c0_24] : memref<8x32xbf16, #tpu.memory_space<vmem>>, vector<8x32xbf16>
    tpu.vector_store %arg3[%c0_23, %c0_24], %51 {strides = array<i32>} : memref<8x32xbf16, #tpu.memory_space<vmem>>, vector<8x32xbf16>,
    %c0_25 = arith.constant 0 : index
    %c0_26 = arith.constant 0 : index
    %53 = vector.load %arg4[%c0_25, %c0_26] : memref<8x1xf32, #tpu.memory_space<vmem>>, vector<8x1xf32>
    tpu.vector_store %arg4[%c0_25, %c0_26], %35 {strides = array<i32>} : memref<8x1xf32, #tpu.memory_space<vmem>>, vector<8x1xf32>,
    %c0_27 = arith.constant 0 : index
    %c0_28 = arith.constant 0 : index
    %54 = vector.load %arg5[%c0_27, %c0_28] : memref<8x1xf32, #tpu.memory_space<vmem>>, vector<8x1xf32>
    tpu.vector_store %arg5[%c0_27, %c0_28], %40 {strides = array<i32>} : memref<8x1xf32, #tpu.memory_space<vmem>>, vector<8x1xf32>,
    return
  }
}

</mosaic_0001>

<bundles_post_ra>
// kernel: tpu_custom_call.1
= control target key start
LH: loop header
LB: loop body
LE: loop exit
PB: predicated region body
PF: predicated region fallthrough
CT: control target
= control target key end

     0   :  { %13 = vsyncpa [#allocation4], 0  ;;  %s302_s0 = inlined_call_operand.hbm [shape: f32[8,32], index: 0, kind: input, shape index: {}]   ;;  %s303_s1 = inlined_call_operand.hbm [shape: f32[8,32], index: 1, kind: input, shape index: {}]   ;;  %s304_s2 = inlined_call_operand.<no memory space> [shape: f32[1,1], index: 2, kind: input, shape index: {}]   ;;  %s305_s3 = inlined_call_operand.hbm [shape: bf16[8,32], index: 3, kind: output, shape index: {0}]   ;;  %s306_s4 = inlined_call_operand.vmem [shape: f32[8,1], index: 4, kind: output, shape index: {1}]   ;;  %s307_s5 = inlined_call_operand.vmem [shape: f32[8,1], index: 5, kind: output, shape index: {2}]   ;;  %s308_s6 = inlined_call_operand.hbm [shape: f32[1,1], index: 6, kind: output, shape index: {3}]  }
   0x1   :  { %14 = vsyncpa [#allocation8], 0 }
   0x2   :  { %15 = vsyncpa [#allocation5], 0 }
   0x3   :  { %16 = vsyncpa [#allocation6], 0  ;;  %s236_s21 = smov [#allocation3]   ;;  %s237_s23 = smov [#allocation7]  }
   0x4   :  { %s23_s22 = sshll.u32 %s236_s21, 4  ;;  %s33_s24 = sshll.u32 %s237_s23, 4  ;;  %s24_s22 = int_to_ptr.vmem [resolvable:$true] %s23_s22  ;;  %s34_s24 = int_to_ptr.vmem [resolvable:$true] %s33_s24 }
   0x5   :  { %s168_s25 = scalar_lea.vmem %s24_s22, 128  ;;  %p173_p1 = scmp.lt.s32.totalorder %s24_s22, %s24_s22 }
   0x6   :  { %p169_p0 = scmp.ne.s32.totalorder %s24_s22, %s168_s25  ;;  %p174_p2 = scmp.lt.s32.totalorder %s168_s25, %s168_s25 }
   0x8   :  { %p175_p3 = por %p174_p2, %p173_p1 }
   0xa   :  { %p176_p4 = pnand %p175_p3, %p169_p0 }
   0xc   :  { %179 = shalt.err (!%p176_p4)
}
   0xd   :  { %26 = dma.hbm_to_vmem [thread:$0]  %s302_s0, 128, %s24_s22, [#allocation4]  }
   0xe   :  { %s188_s28 = scalar_lea.vmem %s34_s24, 128  ;;  %p193_p6 = scmp.lt.s32.totalorder %s34_s24, %s34_s24 }
   0xf   :  { %p189_p5 = scmp.ne.s32.totalorder %s34_s24, %s188_s28  ;;  %p194_p7 = scmp.lt.s32.totalorder %s188_s28, %s188_s28 }
  0x11   :  { %p195_p8 = por %p194_p7, %p193_p6 }
  0x13   :  { %p196_p9 = pnand %p195_p8, %p189_p5 }
  0x15   :  { %199 = shalt.err (!%p196_p9)
}
  0x16   :  { %36 = dma.hbm_to_vmem [thread:$0]  %s303_s1, 128, %s34_s24, [#allocation8]  }
  0x17   :  { %228 = dma.done.wait [#allocation4], 128  }
  0x18   :  { %229 = vsyncadd [#allocation4], 4294967168 }
  0x19   :  { %230 = dma.done.wait [#allocation8], 128  }
  0x1a   :  { %231 = vsyncadd [#allocation8], 4294967168  ;;  %v45_v0 = vld [vmem:[#allocation3] sm:$0xff]  ;;  %vm48_vm0 = vcmask 261120   ;;  %v46_v1 = vld [vmem:[#allocation7] sm:$0xff]  ;;  %vm105_vm1 = vcmask 257024  }
  0x1b   :  { %v47_v2 = vmul.f32 %v45_v0, %v45_v0  ;;  %v55_v3 = vmul.f32 %v46_v1, %v46_v1  ;;  %vm85_vm2 = vcmask 7168   ;;  %s238_s9 = smov [#allocation9]  }
  0x1c   :  { %s115_s10 = sshll.u32 %s238_s9, 4  ;;  %s116_s10 = int_to_ptr.vmem [resolvable:$true] %s115_s10 }
  0x1d   :  { %v49_v4 = vsel %vm48_vm0, %v47_v2, 0.0  ;;  %v56_v5 = vsel %vm48_vm0, %v55_v3, 0.0  ;;  %s200_s11 = scalar_lea.vmem %s116_s10, 64  ;;  %p205_p11 = scmp.lt.s32.totalorder %s116_s10, %s116_s10 }
  0x1e   :  { %50 = vadd.xlane.f32.xlu0 %v49_v4  ;;  %p201_p10 = scmp.ne.s32.totalorder %s116_s10, %s200_s11  ;;  %p206_p12 = scmp.lt.s32.totalorder %s200_s11, %s200_s11 }
  0x20   :  { %p207_p13 = por %p206_p12, %p205_p11 }
  0x22   :  { %57 = vadd.xlane.f32.xlu0 %v56_v5  ;;  %p208_p0 = pnand %p207_p13, %p201_p10 }
  0xa7   :  { %v51_v6 = vpop.xlane.xlu0 %50 }
  0xa8   :  { %v52_v7 = vmax.f32 %v51_v6, 1e-24 }
  0xaa   :  { %154 = vrsqrt.f32 %v52_v7 }
  0xab   :  { %v58_v8 = vpop.xlane.xlu0 %57 }
  0xac   :  { %v59_v9 = vmax.f32 %v58_v8, 1e-24 }
  0xae   :  { %156 = vrsqrt.f32 %v59_v9 }
  0xb7   :  { %v155_v10 = vpop.eup %154 }
  0xb8   :  { %v54_v11 = vmul.f32 %v155_v10, %v45_v0 }
  0xba   :  { %v104_v12 = vpack.c.bf16 %v54_v11, %v54_v11 }
  0xbb   :  { %v157_v13 = vpop.eup %156 }
  0xbc   :  { %v61_v14 = vmul.f32 %v157_v13, %v46_v1  ;;  %106 = vst.msk [vmem:[#allocation9] sm:$0xf] %vm105_vm1, %v104_v12 }
  0xbe   :  { %v62_v15 = vmul.f32 %v61_v14, %v54_v11 }
  0xc0   :  { %v63_v16 = vsel %vm48_vm0, %v62_v15, 0.0 }
  0xc1   :  { %64 = vadd.xlane.f32.xlu1 %v63_v16 }
 0x14a   :  { %v65_v17 = vpop.xlane.xlu1 %64 }
 0x14b   :  { %v146_v18 = vclamps-f32 %v65_v17, 1.0 }
 0x14d   :  { %v68_v19 = vmul.f32 %v146_v18, %v146_v18  ;;  %v86_v20 = vsel %vm85_vm2, %v146_v18, 0.0  ;;  %v78_v28 = vmul.f32 0.87758255, %v146_v18  ;;  %v147_v31 = vadd.f32 -0.23971277, %v146_v18 }
 0x14e   :  { %87 = vadd.xlane.f32.xlu1 %v86_v20  ;;  %vm81_vm5 = vcmp.gt.f32.partialorder %v146_v18, -0.87758255 }
 0x14f   :  { %v69_v21 = vsub.f32 1.0, %v68_v19 }
 0x151   :  { %v70_v22 = vmax.f32 %v69_v21, 0.0 }
 0x153   :  { %158 = vrsqrt.f32 %v70_v22  ;;  %vm73_vm3 = vcmp.eq.f32.partialorder %v70_v22, inf  ;;  %v76_v25 = vand.u32 2147483648, %v70_v22  ;;  %vm75_vm4 = vcmp.eq.f32.partialorder %v70_v22, 0.0 }
 0x160   :  { %v159_v23 = vpop.eup %158 }
 0x161   :  { %v72_v24 = vmul.f32 %v159_v23, %v70_v22 }
 0x163   :  { %v74_v26 = vsel %vm73_vm3, %v70_v22, %v72_v24 }
 0x164   :  { %v77_v27 = vsel %vm75_vm4, %v76_v25, %v74_v26 }
 0x165   :  { %v79_v29 = vmul.f32 0.47942555, %v77_v27 }
 0x167   :  { %v80_v30 = vsub.f32 %v78_v28, %v79_v29 }
 0x169   :  { %v83_v32 = vsel %vm81_vm5, %v80_v30, %v147_v31  ;;  %107 = vst.msk [vmem:[%s306_s4] sm:$0xff] %vm85_vm2, %v80_v30 }
 0x16a   :  { %108 = vst.msk [vmem:[%s307_s5] sm:$0xff] %vm85_vm2, %v83_v32 }
 0x16b   :  { %211 = shalt.err (!%p208_p0)
}
 0x16c   :  { %118 = dma.vmem_to_hbm [thread:$0]  %s116_s10, 64, %s305_s3, [#allocation5]  }
 0x16d   :  { %s100_s15 = smul.f32 0.99, %s304_s2  ;;  %s239_s19 = smov [#allocation10]  }
 0x1d7   :  { %v88_v33 = vpop.xlane.xlu1 %87 }
 0x1d8   :  { %v89_v34 = vrot.slane %v88_v33, 4 }
 0x1da   :  { %v90_v35 = vadd.f32 %v89_v34, %v88_v33 }
 0x1dc   :  { %v91_v36 = vrot.slane %v90_v35, 2 }
 0x1de   :  { %v92_v37 = vadd.f32 %v91_v36, %v90_v35 }
 0x1e0   :  { %v93_v38 = vrot.slane %v92_v37, 1 }
 0x1e2   :  { %v94_v39 = vadd.f32 %v93_v38, %v92_v37 }
 0x1e4   :  { %148 = vpush %v94_v39 }
 0x215   :  { %s149_s4 = spop %148 }
 0x216   :  { %s98_s16 = smul.f32 0.125, %s149_s4 }
 0x218   :  { %s99_s17 = smul.f32 0.01, %s98_s16 }
 0x21a   :  { %s101_s18 = sadd.f32 %s100_s15, %s99_s17 }
 0x21c   :  { %103 = sst [smem:[#allocation10]] %s101_s18 }
 0x21d   :  { %130 = dma.smem_to_hbm %s239_s19, 16, %s308_s6, [#allocation6]  }
 0x21e   :  { %232 = dma.done.wait [#allocation5], 64  }
 0x21f   :  { %233 = vsyncadd [#allocation5], 4294967232 }
 0x220   :  { %234 = dma.done.wait [#allocation6], 16  }
 0x221   :  { %235 = vsyncadd [#allocation6], 4294967280 }
 0x222   :  { %141 = sfence }
 0x223   :  { %142 = vsyncpa [#allocation4], 1 }
 0x224   :  { %143 = vsyncpa [#allocation8], 1 }
 0x225   :  { %144 = vsyncpa [#allocation5], 1 }
 0x226   :  { %145 = vsyncpa [#allocation6], 1 }

</bundles_post_ra>
